<compile_context>
chip_gen: v5e
topology: v5e:2x2
jax: 0.10.0
libtpu: 0.0.40
codegen_flags: <defaults>
</compile_context>

<pallas_src>
import functools

import numpy as np
import jax
import jax.numpy as jnp
from jax.experimental import pallas as pl
from jax.experimental.pallas import tpu as pltpu

# ----------------------------------------------------------------------------
# cfg (deterministic, in-script; standard Faster R-CNN defaults)
# ----------------------------------------------------------------------------
FG_THRESH = 0.5
BG_THRESH_HI = 0.5
BG_THRESH_LO = 0.0
FG_FRACTION = 0.25
PE_FRACTION = 0.25
PH_FRACTION = 0.25
TRAIN_BATCH_SIZE = 16                      # rois_per_image
BBOX_NORMALIZE_MEANS = (0.0, 0.0, 0.0, 0.0)
BBOX_NORMALIZE_STDS = (0.1, 0.1, 0.2, 0.2)
BBOX_INSIDE_WEIGHTS = (1.0, 1.0, 1.0, 1.0)
BBOX_NORMALIZE_TARGETS_PRECOMPUTED = True


# ----------------------------------------------------------------------------
# Kernel 1: batched bbox_overlaps + max/argmax over gt axis + label gather.
#   rois_ref : (B, 4, N_pad)  rows = x1, y1, x2, y2 ; roi axis in lanes
#   gt_ref   : (B, K_pad, 8)  cols 0..4 = x1, y1, x2, y2, cls ; gt axis in sublanes
#   out_ref  : (B, 3, N_pad)  rows = max_overlap, argmax (as f32), label
# ----------------------------------------------------------------------------
def _overlaps_kernel(rois_ref, gt_ref, out_ref):
    rois = rois_ref[...]                      # (B, 4, N)
    gt = gt_ref[...]                          # (B, K, 8)

    ax1 = rois[:, 0:1, :]                     # (B, 1, N)
    ay1 = rois[:, 1:2, :]
    ax2 = rois[:, 2:3, :]
    ay2 = rois[:, 3:4, :]

    gx1 = gt[:, :, 0:1]                       # (B, K, 1)
    gy1 = gt[:, :, 1:2]
    gx2 = gt[:, :, 2:3]
    gy2 = gt[:, :, 3:4]
    gcls = gt[:, :, 4:5]                      # (B, K, 1)

    aw = ax2 - ax1 + 1.0                      # (B, 1, N)
    ah = ay2 - ay1 + 1.0
    gw = gx2 - gx1 + 1.0                      # (B, K, 1)
    gh = gy2 - gy1 + 1.0
    a_area = aw * ah                          # (B, 1, N)
    g_area = gw * gh                          # (B, K, 1)

    iw = jnp.minimum(ax2, gx2) - jnp.maximum(ax1, gx1) + 1.0   # (B, K, N)
    iw = jnp.maximum(iw, 0.0)
    ih = jnp.minimum(ay2, gy2) - jnp.maximum(ay1, gy1) + 1.0
    ih = jnp.maximum(ih, 0.0)
    inter = iw * ih                           # (B, K, N)

    ua = a_area + g_area - inter
    ov = inter / ua

    gt_zero = jnp.logical_and(gw == 1.0, gh == 1.0)   # (B, K, 1)
    a_zero = jnp.logical_and(aw == 1.0, ah == 1.0)    # (B, 1, N)
    ov = jnp.where(gt_zero, 0.0, ov)
    ov = jnp.where(a_zero, -1.0, ov)

    maxv = jnp.max(ov, axis=1, keepdims=True)                     # (B, 1, N)
    kpad = ov.shape[1]
    kidx = jax.lax.broadcasted_iota(jnp.int32, ov.shape, 1)       # (B, K, N)
    arg = jnp.min(jnp.where(ov == maxv, kidx, kpad),
                  axis=1, keepdims=True)                          # (B, 1, N) int32

    # label gather: labels[n] = gt_cls[argmax[n]]  (one-hot sum over gt axis)
    onehot = kidx == arg                                          # (B, K, N)
    labels = jnp.sum(jnp.where(onehot, gcls, 0.0),
                     axis=1, keepdims=True)                       # (B, 1, N)

    packed = jnp.concatenate(
        [maxv, arg.astype(jnp.float32), labels], axis=1)          # (B, 3, N)
    out_ref[...] = packed.astype(jnp.float32)


@jax.jit
def _run_overlaps_kernel(rois_t, gt_k1):
    B, _, n_pad = rois_t.shape
    k_pad = gt_k1.shape[1]
    return pl.pallas_call(
        _overlaps_kernel,
        out_shape=jax.ShapeDtypeStruct((B, 3, n_pad), jnp.float32),
        grid_spec=pltpu.PrefetchScalarGridSpec(
            num_scalar_prefetch=0,
            grid=(1,),                                   # whole batch in one step
            in_specs=[
                pl.BlockSpec((B, 4, n_pad), lambda i: (0, 0, 0)),
                pl.BlockSpec((B, k_pad, 8), lambda i: (0, 0, 0)),
            ],
            out_specs=pl.BlockSpec((B, 3, n_pad), lambda i: (0, 0, 0)),
        ),
        compiler_params=pltpu.CompilerParams(
            dimension_semantics=("arbitrary",)),
    )(rois_t, gt_k1)


# ----------------------------------------------------------------------------
# Kernel 2: bbox regression targets + normalization + class-masked expansion.
#   x_ref   : (B, 9, R_pad)   rows 0-3 ex(x1,y1,x2,y2), 4-7 gt(x1,y1,x2,y2), 8 label
#   out_ref : (B, 12, R_pad)  rows 0-3 targets, 4-7 inside w, 8-11 outside w
# Normalization means/stds and inside weights are baked in as constants.
# ----------------------------------------------------------------------------
def _targets_kernel(x_ref, out_ref):
    x = x_ref[...]                             # (B, 9, R)
    ex1 = x[:, 0:1, :]
    ey1 = x[:, 1:2, :]
    ex2 = x[:, 2:3, :]
    ey2 = x[:, 3:4, :]
    gx1 = x[:, 4:5, :]
    gy1 = x[:, 5:6, :]
    gx2 = x[:, 6:7, :]
    gy2 = x[:, 7:8, :]
    lbl = x[:, 8:9, :]

    ew = ex2 - ex1 + 1.0
    eh = ey2 - ey1 + 1.0
    ecx = ex1 + 0.5 * ew
    ecy = ey1 + 0.5 * eh
    gw = gx2 - gx1 + 1.0
    gh = gy2 - gy1 + 1.0
    gcx = gx1 + 0.5 * gw
    gcy = gy1 + 0.5 * gh

    tgts = [(gcx - ecx) / ew,
            (gcy - ecy) / eh,
            jnp.log(gw / ew),
            jnp.log(gh / eh)]

    mask = lbl > 0.0                           # (B, 1, R)
    rows = []
    for c in range(4):                         # normalized, class-masked targets
        tc = tgts[c]
        if BBOX_NORMALIZE_TARGETS_PRECOMPUTED:
            tc = (tc - BBOX_NORMALIZE_MEANS[c]) / BBOX_NORMALIZE_STDS[c]
        rows.append(jnp.where(mask, tc, 0.0))
    for c in range(4):                         # inside weights
        rows.append(jnp.where(mask, jnp.float32(BBOX_INSIDE_WEIGHTS[c]), 0.0))
    for c in range(4):                         # outside weights = (inside > 0)
        rows.append((rows[4 + c] > 0.0).astype(jnp.float32))

    out_ref[...] = jnp.concatenate(rows, axis=1).astype(jnp.float32)


@functools.partial(jax.jit, static_argnames=("r",))
def _run_targets_kernel(packed_in, *, r):
    B, rows, r_pad = packed_in.shape
    out = pl.pallas_call(
        _targets_kernel,
        out_shape=jax.ShapeDtypeStruct((B, 12, r_pad), jnp.float32),
        grid_spec=pltpu.PrefetchScalarGridSpec(
            num_scalar_prefetch=0,
            grid=(1,),
            in_specs=[pl.BlockSpec((B, rows, r_pad), lambda i: (0, 0, 0))],
            out_specs=pl.BlockSpec((B, 12, r_pad), lambda i: (0, 0, 0)),
        ),
        compiler_params=pltpu.CompilerParams(
            dimension_semantics=("arbitrary",)),
    )(packed_in)
    bbox_targets = jnp.transpose(out[:, 0:4, :r], (0, 2, 1))
    bbox_inside = jnp.transpose(out[:, 4:8, :r], (0, 2, 1))
    bbox_outside = jnp.transpose(out[:, 8:12, :r], (0, 2, 1))
    return bbox_targets, bbox_inside, bbox_outside


# ----------------------------------------------------------------------------
# Host-side RoI sampling (data-dependent control flow + np.random, mirroring
# the original PyTorch, which also runs this on host).
# ----------------------------------------------------------------------------
def _sample_rois_host(max_overlaps, gt_assignment, labels, cls_scores,
                      all_rois, gt_boxes, pe_rois_per_image, ph_rois_per_image,
                      rois_per_image):
    B = max_overlaps.shape[0]
    labels_batch = np.zeros((B, rois_per_image), np.float32)
    overlaps_indece_batch = np.full((B, rois_per_image), 100, np.int32)
    rois_batch = np.zeros((B, rois_per_image, 5), np.float32)
    gt_rois_batch = np.zeros((B, rois_per_image, 5), np.float32)
    pe_num = ph_num = nh_num = 0

    for i in range(B):
        pos_easy = np.nonzero((max_overlaps[i] >= FG_THRESH) &
                              (cls_scores[i] >= FG_THRESH))[0]
        pos_hard = np.nonzero((max_overlaps[i] >= FG_THRESH) &
                              (cls_scores[i] <= FG_THRESH))[0]
        neg_hard = np.nonzero((max_overlaps[i] < BG_THRESH_HI) &
                              (max_overlaps[i] >= BG_THRESH_LO))[0]
        pe_num, ph_num, nh_num = len(pos_easy), len(pos_hard), len(neg_hard)

        if pe_num > 0 and ph_num > 0 and nh_num > 0:
            pe_img = min(pe_rois_per_image, pe_num)
            perm = np.random.permutation(pe_img)
            pos_easy = pos_easy[perm[:pe_img]]
            ph_img = min(ph_rois_per_image, ph_num)
            perm = np.random.permutation(ph_img)
            pos_hard = pos_hard[perm[:ph_img]]
            nh_img = rois_per_image - pe_img - ph_img
            rnd = np.floor(np.random.rand(nh_img) * nh_num).astype(np.int64)
            neg_hard = neg_hard[rnd]
        elif pe_num > 0 and ph_num == 0 and nh_num > 0:
            pe_rois_per_image = int(np.round(FG_FRACTION * rois_per_image))
            pe_img = min(pe_rois_per_image, pe_num)
            perm = np.random.permutation(pe_img)
            pos_easy = pos_easy[perm[:pe_img]]
            ph_img = 0
            nh_img = rois_per_image - pe_img - ph_img
            rnd = np.floor(np.random.rand(nh_img) * nh_num).astype(np.int64)
            neg_hard = neg_hard[rnd]
        elif pe_num > 0 and ph_num == 0 and nh_num == 0:
            rnd = np.floor(np.random.rand(rois_per_image) * pe_num).astype(np.int64)
            pos_easy = pos_easy[rnd]
            pe_img, ph_img, nh_img = rois_per_image, 0, 0
        elif pe_num > 0 and ph_num > 0 and nh_num == 0:
            pe_rois_per_image = int(np.round(FG_FRACTION * rois_per_image))
            pe_img = min(pe_rois_per_image, pe_num)
            perm = np.random.permutation(pe_img)
            pos_easy = pos_easy[perm[:pe_img]]
            nh_img = 0
            ph_img = rois_per_image - pe_img - nh_img
            rnd = np.floor(np.random.rand(ph_img) * ph_num).astype(np.int64)
            pos_hard = pos_hard[rnd]
        elif pe_num == 0 and ph_num == 0 and nh_num > 0:
            rnd = np.floor(np.random.rand(rois_per_image) * nh_num).astype(np.int64)
            neg_hard = neg_hard[rnd]
            nh_img, pe_img, ph_img = rois_per_image, 0, 0
        elif pe_num == 0 and ph_num > 0 and nh_num == 0:
            rnd = np.floor(np.random.rand(rois_per_image) * ph_num).astype(np.int64)
            pos_hard = pos_hard[rnd]
            ph_img, pe_img, nh_img = rois_per_image, 0, 0
        elif pe_num == 0 and ph_num > 0 and nh_num > 0:
            ph_rois_per_image = int(np.round(0.5 * rois_per_image))
            ph_img = min(ph_rois_per_image, ph_num)
            perm = np.random.permutation(ph_img)
            pos_hard = pos_hard[perm[:ph_img]]
            pe_img = 0
            nh_img = rois_per_image - pe_img - ph_img
            rnd = np.floor(np.random.rand(nh_img) * nh_num).astype(np.int64)
            neg_hard = neg_hard[rnd]
        else:
            raise ValueError(
                'pos_easy_num = 0, pos_hard_num = 0 and neg_hard_num = 0, '
                'this should not happen!')

        keep = np.concatenate([pos_easy, pos_hard, neg_hard], axis=0)
        labels_batch[i] = labels[i][keep]
        overlaps_indece_batch[i] = gt_assignment[i][keep]
        fg = pe_img + ph_img
        if fg < rois_per_image:
            labels_batch[i][fg:] = 0
        rois_batch[i] = all_rois[i][keep]
        rois_batch[i, :, 0] = i
        gt_rois_batch[i] = gt_boxes[i][gt_assignment[i][keep]]

    return (labels_batch, rois_batch, gt_rois_batch, overlaps_indece_batch,
            pe_num, ph_num, nh_num)


def _round_up(x, m):
    return int(((x + m - 1) // m) * m)


# ----------------------------------------------------------------------------
# Module wrapper
# ----------------------------------------------------------------------------
class ProposalTargetLayerOM:
    def __init__(self, nclasses):
        self._num_classes = nclasses

    def forward(self, all_rois, gt_boxes, num_boxes, cls_scores):
        # Single consolidated device->host fetch of the raw inputs.
        rois_np, gt_np, scores_np = jax.device_get((all_rois, gt_boxes, cls_scores))
        rois_np = np.asarray(rois_np, np.float32)
        gt_np = np.asarray(gt_np, np.float32)
        scores_np = np.asarray(scores_np, np.float32)

        B, N, _ = rois_np.shape
        K = gt_np.shape[1]

        # Append gt boxes as rois (col0 = 0) and gt x1 as extra "scores"
        # (exact reference semantics), done host-side in numpy.
        gt_append = np.zeros((B, K, 5), np.float32)
        gt_append[:, :, 1:5] = gt_np[:, :, :4]
        all_rois_cat = np.concatenate([rois_np, gt_append], axis=1)      # (B, Nt, 5)
        cls_scores_cat = np.concatenate([scores_np, gt_np[:, :, 0]], axis=1)

        rois_per_image = int(TRAIN_BATCH_SIZE / 1)
        pe_rois_per_image = int(np.round(PE_FRACTION * rois_per_image)) or 1
        ph_rois_per_image = int(np.round(PH_FRACTION * rois_per_image)) or 1

        # ---- hot path 1: IoU + max/argmax + label gather (Pallas, 1 step) ----
        Nt = N + K
        n_pad = max(128, _round_up(Nt, 128))
        k_pad = _round_up(max(K, 1), 8)

        rois_t = np.zeros((B, 4, n_pad), np.float32)            # roi axis -> lanes
        rois_t[:, :, :Nt] = np.transpose(all_rois_cat[:, :, 1:5], (0, 2, 1))
        gt_k1 = np.zeros((B, k_pad, 8), np.float32)             # gt axis -> sublanes
        gt_k1[:, :K, :5] = gt_np[:, :, :5]

        packed = jax.device_get(_run_overlaps_kernel(rois_t, gt_k1))   # one transfer
        max_overlaps = packed[:, 0, :Nt]
        gt_assignment = packed[:, 1, :Nt].astype(np.int32)
        labels = packed[:, 2, :Nt]

        # Host-side sampling (data-dependent control flow + np.random).
        (labels_batch, rois_batch, gt_rois_batch, overlaps_indece_batch,
         pe_num, ph_num, nh_num) = _sample_rois_host(
            max_overlaps, gt_assignment, labels, cls_scores_cat,
            all_rois_cat, gt_np, pe_rois_per_image, ph_rois_per_image,
            rois_per_image)

        # ---- hot path 2: bbox transform + normalize + masking (Pallas) ----
        R = rois_per_image
        r_pad = max(128, _round_up(R, 128))
        k2_in = np.zeros((B, 9, r_pad), np.float32)             # single packed upload
        k2_in[:, 0:4, :R] = np.transpose(rois_batch[:, :, 1:5], (0, 2, 1))
        k2_in[:, 4:8, :R] = np.transpose(gt_rois_batch[:, :, 0:4], (0, 2, 1))
        k2_in[:, 8, :R] = labels_batch

        bbox_targets, bbox_inside_weights, bbox_outside_weights = \
            _run_targets_kernel(k2_in, r=R)

        rois = jnp.asarray(rois_batch)
        labels_out = jnp.asarray(labels_batch)
        overlaps_indece = jnp.asarray(overlaps_indece_batch, dtype=jnp.int32)
        return (rois, labels_out, bbox_targets, bbox_inside_weights,
                bbox_outside_weights, overlaps_indece, pe_num, ph_num, nh_num)


# ----------------------------------------------------------------------------
if __name__ == "__main__":
    np.random.seed(0)
    key = jax.random.PRNGKey(0)
    k1, k2, k3, k4, k5, k6 = jax.random.split(key, 6)

    B, N_ROIS, K_GT = 2, 16, 8
    NCLASSES = 5

    # gt boxes: [x1, y1, x2, y2, cls]
    gx1 = jax.random.uniform(k1, (B, K_GT), minval=0.0, maxval=60.0)
    gy1 = jax.random.uniform(k2, (B, K_GT), minval=0.0, maxval=60.0)
    gx2 = gx1 + jax.random.uniform(k3, (B, K_GT), minval=8.0, maxval=40.0)
    gy2 = gy1 + jax.random.uniform(k4, (B, K_GT), minval=8.0, maxval=40.0)
    gcls = jax.random.randint(k5, (B, K_GT), 1, NCLASSES).astype(jnp.float32)
    gt_boxes = jnp.stack([gx1, gy1, gx2, gy2, gcls], axis=-1)

    # rois: [batch_idx, x1, y1, x2, y2]
    ka, kb, kc, kd, ke = jax.random.split(k6, 5)
    rx1 = jax.random.uniform(ka, (B, N_ROIS), minval=0.0, maxval=60.0)
    ry1 = jax.random.uniform(kb, (B, N_ROIS), minval=0.0, maxval=60.0)
    rx2 = rx1 + jax.random.uniform(kc, (B, N_ROIS), minval=4.0, maxval=50.0)
    ry2 = ry1 + jax.random.uniform(kd, (B, N_ROIS), minval=4.0, maxval=50.0)
    bidx = jnp.broadcast_to(
        jnp.arange(B, dtype=jnp.float32)[:, None], (B, N_ROIS))
    all_rois = jnp.stack([bidx, rx1, ry1, rx2, ry2], axis=-1)

    cls_scores = jax.random.uniform(ke, (B, N_ROIS), minval=0.0, maxval=1.0)
    num_boxes = jnp.full((B,), K_GT, dtype=jnp.int32)

    layer = ProposalTargetLayerOM(NCLASSES)
    out = layer.forward(all_rois, gt_boxes, num_boxes, cls_scores)

    for o in out[:6]:
        jax.block_until_ready(o)
    print("KERNEL_OK")
</pallas_src>

<mosaic_0001>
module attributes {stable_mosaic.version = 11 : i64} {
  func.func @_overlaps_kernel(%arg0: i32, %arg1: memref<2x4x128xf32, #tpu.memory_space<vmem>>, %arg2: memref<2x8x8xf32, #tpu.memory_space<vmem>>, %arg3: memref<2x3x128xf32, #tpu.memory_space<vmem>>) attributes {dimension_semantics = [#tpu.dimension_semantics<arbitrary>], iteration_bounds = array<i64: 1>, scalar_prefetch = 0 : i64, scratch_operands = 0 : i64, tpu.core_type = #tpu.core_type<tc>, window_params = [{pipeline_mode = #tpu.pipeline_mode<synchronous>, transform_indices = @transform_0, window_bounds = array<i64: 2, 4, 128>}, {pipeline_mode = #tpu.pipeline_mode<synchronous>, transform_indices = @transform_1, window_bounds = array<i64: 2, 8, 8>}, {pipeline_mode = #tpu.pipeline_mode<synchronous>, transform_indices = @transform_2, window_bounds = array<i64: 2, 3, 128>}]} {
    %c0 = arith.constant 0 : index
    %c0_0 = arith.constant 0 : index
    %c0_1 = arith.constant 0 : index
    %0 = vector.load %arg1[%c0, %c0_0, %c0_1] : memref<2x4x128xf32, #tpu.memory_space<vmem>>, vector<2x4x128xf32>
    %c0_2 = arith.constant 0 : index
    %c0_3 = arith.constant 0 : index
    %c0_4 = arith.constant 0 : index
    %1 = vector.load %arg2[%c0_2, %c0_3, %c0_4] : memref<2x8x8xf32, #tpu.memory_space<vmem>>, vector<2x8x8xf32>
    %2 = vector.extract_strided_slice %0 {offsets = [0, 0, 0], sizes = [2, 1, 128], strides = [1, 1, 1]} : vector<2x4x128xf32> to vector<2x1x128xf32>
    %3 = vector.extract_strided_slice %0 {offsets = [0, 1, 0], sizes = [2, 1, 128], strides = [1, 1, 1]} : vector<2x4x128xf32> to vector<2x1x128xf32>
    %4 = vector.extract_strided_slice %0 {offsets = [0, 2, 0], sizes = [2, 1, 128], strides = [1, 1, 1]} : vector<2x4x128xf32> to vector<2x1x128xf32>
    %5 = vector.extract_strided_slice %0 {offsets = [0, 3, 0], sizes = [2, 1, 128], strides = [1, 1, 1]} : vector<2x4x128xf32> to vector<2x1x128xf32>
    %6 = vector.extract_strided_slice %1 {offsets = [0, 0, 0], sizes = [2, 8, 1], strides = [1, 1, 1]} : vector<2x8x8xf32> to vector<2x8x1xf32>
    %7 = vector.extract_strided_slice %1 {offsets = [0, 0, 1], sizes = [2, 8, 1], strides = [1, 1, 1]} : vector<2x8x8xf32> to vector<2x8x1xf32>
    %8 = vector.extract_strided_slice %1 {offsets = [0, 0, 2], sizes = [2, 8, 1], strides = [1, 1, 1]} : vector<2x8x8xf32> to vector<2x8x1xf32>
    %9 = vector.extract_strided_slice %1 {offsets = [0, 0, 3], sizes = [2, 8, 1], strides = [1, 1, 1]} : vector<2x8x8xf32> to vector<2x8x1xf32>
    %10 = vector.extract_strided_slice %1 {offsets = [0, 0, 4], sizes = [2, 8, 1], strides = [1, 1, 1]} : vector<2x8x8xf32> to vector<2x8x1xf32>
    %11 = arith.subf %4, %2 : vector<2x1x128xf32>
    %cst = arith.constant 1.000000e+00 : f32
    %12 = vector.broadcast %cst : f32 to vector<2x1x128xf32>
    %13 = arith.addf %11, %12 : vector<2x1x128xf32>
    %14 = arith.subf %5, %3 : vector<2x1x128xf32>
    %cst_5 = arith.constant 1.000000e+00 : f32
    %15 = vector.broadcast %cst_5 : f32 to vector<2x1x128xf32>
    %16 = arith.addf %14, %15 : vector<2x1x128xf32>
    %17 = arith.subf %8, %6 : vector<2x8x1xf32>
    %cst_6 = arith.constant 1.000000e+00 : f32
    %18 = vector.broadcast %cst_6 : f32 to vector<2x8x1xf32>
    %19 = arith.addf %17, %18 : vector<2x8x1xf32>
    %20 = arith.subf %9, %7 : vector<2x8x1xf32>
    %cst_7 = arith.constant 1.000000e+00 : f32
    %21 = vector.broadcast %cst_7 : f32 to vector<2x8x1xf32>
    %22 = arith.addf %20, %21 : vector<2x8x1xf32>
    %23 = arith.mulf %13, %16 : vector<2x1x128xf32>
    %24 = arith.mulf %19, %22 : vector<2x8x1xf32>
    %25 = vector.broadcast %4 : vector<2x1x128xf32> to vector<2x8x128xf32>
    %26 = vector.broadcast %8 : vector<2x8x1xf32> to vector<2x8x128xf32>
    %27 = arith.minimumf %25, %26 : vector<2x8x128xf32>
    %28 = vector.broadcast %2 : vector<2x1x128xf32> to vector<2x8x128xf32>
    %29 = vector.broadcast %6 : vector<2x8x1xf32> to vector<2x8x128xf32>
    %30 = arith.maximumf %28, %29 : vector<2x8x128xf32>
    %31 = arith.subf %27, %30 : vector<2x8x128xf32>
    %cst_8 = arith.constant 1.000000e+00 : f32
    %32 = vector.broadcast %cst_8 : f32 to vector<2x8x128xf32>
    %33 = arith.addf %31, %32 : vector<2x8x128xf32>
    %cst_9 = arith.constant 0.000000e+00 : f32
    %34 = vector.broadcast %cst_9 : f32 to vector<2x8x128xf32>
    %35 = arith.maximumf %33, %34 : vector<2x8x128xf32>
    %36 = vector.broadcast %5 : vector<2x1x128xf32> to vector<2x8x128xf32>
    %37 = vector.broadcast %9 : vector<2x8x1xf32> to vector<2x8x128xf32>
    %38 = arith.minimumf %36, %37 : vector<2x8x128xf32>
    %39 = vector.broadcast %3 : vector<2x1x128xf32> to vector<2x8x128xf32>
    %40 = vector.broadcast %7 : vector<2x8x1xf32> to vector<2x8x128xf32>
    %41 = arith.maximumf %39, %40 : vector<2x8x128xf32>
    %42 = arith.subf %38, %41 : vector<2x8x128xf32>
    %cst_10 = arith.constant 1.000000e+00 : f32
    %43 = vector.broadcast %cst_10 : f32 to vector<2x8x128xf32>
    %44 = arith.addf %42, %43 : vector<2x8x128xf32>
    %cst_11 = arith.constant 0.000000e+00 : f32
    %45 = vector.broadcast %cst_11 : f32 to vector<2x8x128xf32>
    %46 = arith.maximumf %44, %45 : vector<2x8x128xf32>
    %47 = arith.mulf %35, %46 : vector<2x8x128xf32>
    %48 = vector.broadcast %23 : vector<2x1x128xf32> to vector<2x8x128xf32>
    %49 = vector.broadcast %24 : vector<2x8x1xf32> to vector<2x8x128xf32>
    %50 = arith.addf %48, %49 : vector<2x8x128xf32>
    %51 = arith.subf %50, %47 : vector<2x8x128xf32>
    %52 = arith.divf %47, %51 : vector<2x8x128xf32>
    %cst_12 = arith.constant 1.000000e+00 : f32
    %53 = vector.broadcast %cst_12 : f32 to vector<2x8x1xf32>
    %54 = arith.cmpf oeq, %19, %53 : vector<2x8x1xf32>
    %cst_13 = arith.constant 1.000000e+00 : f32
    %55 = vector.broadcast %cst_13 : f32 to vector<2x8x1xf32>
    %56 = arith.cmpf oeq, %22, %55 : vector<2x8x1xf32>
    %57 = arith.andi %54, %56 : vector<2x8x1xi1>
    %cst_14 = arith.constant 1.000000e+00 : f32
    %58 = vector.broadcast %cst_14 : f32 to vector<2x1x128xf32>
    %59 = arith.cmpf oeq, %13, %58 : vector<2x1x128xf32>
    %cst_15 = arith.constant 1.000000e+00 : f32
    %60 = vector.broadcast %cst_15 : f32 to vector<2x1x128xf32>
    %61 = arith.cmpf oeq, %16, %60 : vector<2x1x128xf32>
    %62 = arith.andi %59, %61 : vector<2x1x128xi1>
    %cst_16 = arith.constant 0.000000e+00 : f32
    %63 = vector.shape_cast %57 : vector<2x8x1xi1> to vector<2x8x1xi1>
    %64 = vector.broadcast %63 : vector<2x8x1xi1> to vector<2x8x128xi1>
    %65 = vector.broadcast %cst_16 : f32 to vector<2x8x128xf32>
    %66 = arith.select %64, %65, %52 : vector<2x8x128xi1>, vector<2x8x128xf32>
    %cst_17 = arith.constant -1.000000e+00 : f32
    %67 = vector.shape_cast %62 : vector<2x1x128xi1> to vector<2x1x128xi1>
    %68 = vector.broadcast %67 : vector<2x1x128xi1> to vector<2x8x128xi1>
    %69 = vector.broadcast %cst_17 : f32 to vector<2x8x128xf32>
    %70 = arith.select %68, %69, %66 : vector<2x8x128xi1>, vector<2x8x128xf32>
    %cst_18 = arith.constant dense<0xFF800000> : vector<2x128xf32>
    %71 = vector.multi_reduction <maximumf>, %70, %cst_18 [1] : vector<2x8x128xf32> to vector<2x128xf32>
    %72 = vector.shape_cast %71 : vector<2x128xf32> to vector<2x1x128xf32>
    %73 = tpu.iota {dimensions = array<i32: 1>} : vector<2x8x128xi32>
    %74 = vector.broadcast %72 : vector<2x1x128xf32> to vector<2x8x128xf32>
    %75 = arith.cmpf oeq, %70, %74 : vector<2x8x128xf32>
    %c8_i32 = arith.constant 8 : i32
    %76 = vector.broadcast %c8_i32 : i32 to vector<2x8x128xi32>
    %77 = arith.select %75, %73, %76 : vector<2x8x128xi1>, vector<2x8x128xi32>
    %cst_19 = arith.constant dense<2147483647> : vector<2x128xi32>
    %78 = vector.multi_reduction <minsi>, %77, %cst_19 [1] : vector<2x8x128xi32> to vector<2x128xi32>
    %79 = vector.shape_cast %78 : vector<2x128xi32> to vector<2x1x128xi32>
    %80 = vector.broadcast %79 : vector<2x1x128xi32> to vector<2x8x128xi32>
    %81 = arith.cmpi eq, %73, %80 : vector<2x8x128xi32>
    %cst_20 = arith.constant 0.000000e+00 : f32
    %82 = vector.shape_cast %10 : vector<2x8x1xf32> to vector<2x8x1xf32>
    %83 = vector.broadcast %82 : vector<2x8x1xf32> to vector<2x8x128xf32>
    %84 = vector.broadcast %cst_20 : f32 to vector<2x8x128xf32>
    %85 = arith.select %81, %83, %84 : vector<2x8x128xi1>, vector<2x8x128xf32>
    %cst_21 = arith.constant dense<0.000000e+00> : vector<2x128xf32>
    %86 = vector.multi_reduction <add>, %85, %cst_21 [1] : vector<2x8x128xf32> to vector<2x128xf32>
    %87 = vector.shape_cast %86 : vector<2x128xf32> to vector<2x1x128xf32>
    %88 = arith.sitofp %79 : vector<2x1x128xi32> to vector<2x1x128xf32>
    %89 = tpu.concatenate %72, %88, %87 in 1 : vector<2x1x128xf32>, vector<2x1x128xf32>, vector<2x1x128xf32> -> vector<2x3x128xf32>
    %c0_22 = arith.constant 0 : index
    %c0_23 = arith.constant 0 : index
    %c0_24 = arith.constant 0 : index
    %90 = vector.load %arg3[%c0_22, %c0_23, %c0_24] : memref<2x3x128xf32, #tpu.memory_space<vmem>>, vector<2x3x128xf32>
    tpu.vector_store %arg3[%c0_22, %c0_23, %c0_24], %89 {strides = array<i32>} : memref<2x3x128xf32, #tpu.memory_space<vmem>>, vector<2x3x128xf32>,
    return
  }
  func.func @transform_0(%arg0: i32) -> (i32, i32, i32) {
    %c0_i32 = arith.constant 0 : i32
    %c0_i32_0 = arith.constant 0 : i32
    %c0_i32_1 = arith.constant 0 : i32
    %c0_i32_2 = arith.constant 0 : i32
    return %c0_i32, %c0_i32_0, %c0_i32_1 : i32, i32, i32
  }
  func.func @transform_1(%arg0: i32) -> (i32, i32, i32) {
    %c0_i32 = arith.constant 0 : i32
    %c0_i32_0 = arith.constant 0 : i32
    %c0_i32_1 = arith.constant 0 : i32
    %c0_i32_2 = arith.constant 0 : i32
    return %c0_i32, %c0_i32_0, %c0_i32_1 : i32, i32, i32
  }
  func.func @transform_2(%arg0: i32) -> (i32, i32, i32) {
    %c0_i32 = arith.constant 0 : i32
    %c0_i32_0 = arith.constant 0 : i32
    %c0_i32_1 = arith.constant 0 : i32
    %c0_i32_2 = arith.constant 0 : i32
    return %c0_i32, %c0_i32_0, %c0_i32_1 : i32, i32, i32
  }
}

</mosaic_0001>

<bundles_post_ra>
// kernel: _run_overlaps_kernel.1
= control target key start
LH: loop header
LB: loop body
LE: loop exit
PB: predicated region body
PF: predicated region fallthrough
CT: control target
= control target key end

     0   :  { %7 = vsyncpa [#allocation3], 0  ;;  %s461_s0 = inlined_call_operand.hbm [shape: f32[2,4,128], index: 0, kind: input, shape index: {}]   ;;  %s462_s1 = inlined_call_operand.hbm [shape: f32[2,8,8], index: 1, kind: input, shape index: {}]   ;;  %s463_s2 = inlined_call_operand.vmem [shape: f32[2,3,128], index: 2, kind: output, shape index: {}]  }
   0x1   :  { %s13_s11 = sshll.u32 %s461_s0, 4  ;;  %s14_s11 = int_to_ptr.hbm [resolvable:$true] %s13_s11 }
   0x2   :  { %8 = vsyncpa [#allocation5], 0  ;;  %s396_s12 = smov [#allocation2]   ;;  %s26_s16 = sshll.u32 %s462_s1, 4  ;;  %s27_s16 = int_to_ptr.hbm [resolvable:$true] %s26_s16 }
   0x3   :  { %s15_s13 = sshll.u32 %s396_s12, 4  ;;  %s397_s17 = smov 64   ;;  %s16_s13 = int_to_ptr.vmem [resolvable:$true] %s15_s13 }
   0x4   :  { %s398_s18 = smov 4   ;;  %s399_s19 = smov [#allocation4]  }
   0x5   :  { %21 = dma.hbm_to_vmem [thread:$0]  %s14_s11, 128, %s16_s13, [#allocation3], %s397_s17, %s397_s17, %s398_s18  }
   0x6   :  { %s28_s20 = sshll.u32 %s399_s19, 4  ;;  %s400_s21 = smov 128   ;;  %s29_s20 = int_to_ptr.vmem [resolvable:$true] %s28_s20 }
   0x7   :  { %s401_s22 = smov 8  }
   0x8   :  { %34 = dma.hbm_to_vmem [thread:$0]  %s27_s16, 256, %s29_s20, [#allocation5], %s400_s21, %s400_s21, %s401_s22  }
   0x9   :  { %392 = dma.done.wait [#allocation3], 128  }
   0xa   :  { %393 = vsyncadd [#allocation3], 4294967168 }
   0xb   :  { %394 = dma.done.wait [#allocation5], 256  }
   0xc   :  { %395 = vsyncadd [#allocation5], 4294967040  ;;  %v402_v0 = vmov 0   ;;  %v45_v1 = vld [vmem:[#allocation4] sm:$0xff]  ;;  %s403_s0 = smov 2   ;;  %v46_v2 = vld [vmem:[#allocation4 + $0x8] sm:$0xff] }
   0xd   :  { %328 = vset.pattern.permute.xlu2 %v402_v0  ;;  %59 = vrot.lane.b32.xlu0 %v45_v1, %s403_s0  ;;  %v404_v3 = vmov 2   ;;  %s405_s1 = smov 127   ;;  %v406_v9 = vmov 3   ;;  %v407_v13 = vmov 1   ;;  %v408_v21 = vmov 4  }
   0xe   :  { %102 = vperm.xlu2 %328, %v45_v1   ;;  %326 = vset.pattern.permute.xlu0 %v404_v3  ;;  %v44_v25 = vld [vmem:[#allocation2 + $0x4] sm:$0xf]  ;;  %v43_v45 = vld [vmem:[#allocation2] sm:$0xf] }
   0xf   :  { %327 = vset.pattern.permute.xlu1 %v404_v3  ;;  %v50_v28 = vrot.slane %v44_v25, 6  ;;  %v118_v29 = vperm.slane %v44_v25, 3  ;;  %v88_v30 = vperm.slane %v44_v25, 2  ;;  %v100_v31 = vperm.slane %v44_v25, 0 }
  0x10   :  { %v130_v32 = vperm.slane %v44_v25, 1  ;;  %v49_v49 = vrot.slane %v43_v45, 6  ;;  %v129_v50 = vperm.slane %v43_v45, 1  ;;  %v117_v51 = vperm.slane %v43_v45, 3 }
  0x11   :  { %v54_v33 = vsub.f32 %v44_v25, %v50_v28  ;;  %v99_v57 = vperm.slane %v43_v45, 0  ;;  %v87_v58 = vperm.slane %v43_v45, 2 }
  0x12   :  { %v53_v56 = vsub.f32 %v43_v45, %v49_v49 }
  0x13   :  { %v56_v41 = vadd.f32 1.0, %v54_v33 }
  0x15   :  { %61 = vrot.lane.b32.xlu0 %v46_v2, %s403_s0  ;;  %v72_v44 = vrot.slane %v56_v41, 1  ;;  %vm208_vm6 = vcmp.eq.f32.partialorder %v56_v41, 1.0 }
  0x16   :  { %330 = vset.pattern.permute.xlu2 %v406_v9 }
  0x17   :  { %v76_v48 = vmul.f32 %v72_v44, %v56_v41 }
  0x19   :  { %v150_v55 = vperm.slane %v76_v48, 2  ;;  %v249_v48 = vlaneseq }
  0x1d   :  { %90 = vperm.xlu0 %326, %v45_v1  }
  0x25   :  { %331 = vset.pattern.permute.xlu0 %v406_v9 }
  0x26   :  { %124 = vperm.xlu0 %331, %v46_v2  }
  0x2e   :  { %336 = vset.pattern.permute.xlu0 %v404_v3 }
  0x68   :  { %v436_v14 = vpop.permute.xlu2 %102 }
  0x7f   :  { %v60_v4 = vpop.permute.xlu0 %59 }
  0x80   :  { %v65_v5 = vsub.f32 %v45_v1, %v60_v4 }
  0x82   :  { %v67_v6 = vadd.f32 1.0, %v65_v5  ;;  %v210_v5 = vsel %vm208_vm6, 1, %v402_v0 }
  0x83   :  { %v212_v9 = vrot.slane %v210_v5, 1 }
  0x84   :  { %79 = vrot.lane.b32.xlu1 %v67_v6, %s405_s1  ;;  %vm195_vm0 = vcmp.eq.f32.partialorder %v67_v6, 1.0 }
  0x85   :  { %v197_v7 = vsel %vm195_vm0, 1, %v402_v0  ;;  %vm214_vm7 = vcmp.ne.s32.totalorder %v212_v9, 0 }
  0x86   :  { %199 = vrot.lane.b32.xlu2 %v197_v7, %s405_s1  ;;  %vm216_vm8 = vmand %vm208_vm6, %vm214_vm7 }
  0x87   :  { %v62_v8 = vpop.permute.xlu0 %61  ;;  %v230_v25 = vsel %vm216_vm8, 1, %v402_v0 }
  0x88   :  { %v66_v10 = vsub.f32 %v46_v2, %v62_v8 }
  0x8a   :  { %v68_v11 = vadd.f32 1.0, %v66_v10 }
  0x8c   :  { %81 = vrot.lane.b32.xlu1 %v68_v11, %s405_s1  ;;  %vm196_vm1 = vcmp.eq.f32.partialorder %v68_v11, 1.0 }
  0x8d   :  { %v198_v12 = vsel %vm196_vm1, 1, %v402_v0 }
  0x8e   :  { %201 = vrot.lane.b32.xlu2 %v198_v12, %s405_s1 }
  0x8f   :  { %v91_v27 = vpop.permute.xlu0 %90 }
  0x94   :  { %94 = vperm.xlu1 %327, %v46_v2  }
  0x96   :  { %120 = vperm.xlu2 %330, %v45_v1  }
  0x98   :  { %v125_v35 = vpop.permute.xlu0 %124 }
  0x99   :  { %v128_v37 = vmin.f32 %v118_v29, %v125_v35 }
  0x9c   :  { %329 = vset.pattern.permute.xlu1 %v402_v0 }
  0x9d   :  { %106 = vperm.xlu1 %329, %v46_v2  }
  0x9e   :  { %333 = vset.pattern.permute.xlu2 %v407_v13 }
  0x9f   :  { %136 = vperm.xlu2 %333, %v46_v2  }
  0xa5   :  { %332 = vset.pattern.permute.xlu1 %v407_v13 }
  0xa6   :  { %132 = vperm.xlu1 %332, %v45_v1  }
  0xa7   :  { %335 = vset.pattern.permute.xlu2 %v404_v3 }
  0xae   :  { %334 = vset.pattern.permute.xlu1 %v404_v3  ;;  %v97_v3 = vmin.f32 %v87_v58, %v91_v27 }
  0xe0   :  { %v200_v15 = vpop.permute.xlu2 %199 }
  0xe1   :  { %vm203_vm2 = vcmp.ne.s32.totalorder %v200_v15, 0 }
  0xe2   :  { %vm205_vm3 = vmand %vm195_vm0, %vm203_vm2 }
  0xe3   :  { %v217_v16 = vsel %vm205_vm3, 1, %v402_v0 }
  0xe4   :  { %220 = vperm.xlu0 %336, %v217_v16  }
  0xe8   :  { %v202_v18 = vpop.permute.xlu2 %201 }
  0xe9   :  { %vm204_vm4 = vcmp.ne.s32.totalorder %v202_v18, 0 }
  0xea   :  { %vm206_vm5 = vmand %vm196_vm1, %vm204_vm4 }
  0xeb   :  { %v218_v23 = vsel %vm206_vm5, 1, %v402_v0 }
  0xec   :  { %339 = vset.pattern.permute.xlu0 %v408_v21 }
  0xf0   :  { %v121_v26 = vpop.permute.xlu2 %120 }
  0xf1   :  { %v127_v60 = vmin.f32 %v117_v51, %v121_v26 }
  0xf6   :  { %v80_v17 = vpop.permute.xlu1 %79 }
  0xf7   :  { %v85_v19 = vmul.f32 %v80_v17, %v67_v6 }
  0xf9   :  { %153 = vperm.xlu1 %334, %v85_v19   ;;  %v137_v34 = vpop.permute.xlu2 %136 }
  0xfa   :  { %v140_v40 = vmax.f32 %v130_v32, %v137_v34 }
  0xfc   :  { %v142_v43 = vsub.f32 %v128_v37, %v140_v40 }
  0xfe   :  { %v82_v20 = vpop.permute.xlu1 %81  ;;  %v144_v47 = vadd.f32 1.0, %v142_v43 }
  0xff   :  { %v86_v22 = vmul.f32 %v82_v20, %v68_v11 }
 0x100   :  { %v146_v54 = vmax.f32 %v144_v47, 0.0 }
 0x101   :  { %158 = vperm.xlu2 %335, %v86_v22   ;;  %223 = vperm.xlu1 %334, %v218_v23  }
 0x106   :  { %v95_v24 = vpop.permute.xlu1 %94 }
 0x107   :  { %v98_v38 = vmin.f32 %v88_v30, %v95_v24 }
 0x109   :  { %338 = vset.pattern.permute.xlu1 %v408_v21  ;;  %337 = vset.pattern.permute.xlu2 %v408_v21 }
 0x10a   :  { %280 = vperm.xlu1 %338, %v46_v2   ;;  %276 = vperm.xlu2 %337, %v45_v1   ;;  %v55_v1 = vadd.f32 1.0, %v53_v56  ;;  %v109_v2 = vmax.f32 %v99_v57, %v436_v14  ;;  %v250_v57 = vshrl.u32 %v249_v48, 7 }
 0x10c   :  { %v71_v7 = vrot.slane %v55_v1, 1  ;;  %v111_v8 = vsub.f32 %v97_v3, %v109_v2  ;;  %vm207_vm9 = vcmp.eq.f32.partialorder %v55_v1, 1.0 }
 0x10d   :  { %v209_v26 = vsel %vm207_vm9, 1, %v402_v0 }
 0x10e   :  { %v75_v11 = vmul.f32 %v71_v7, %v55_v1  ;;  %v113_v13 = vadd.f32 1.0, %v111_v8  ;;  %v211_v32 = vrot.slane %v209_v26, 1 }
 0x10f   :  { %v107_v36 = vpop.permute.xlu1 %106 }
 0x110   :  { %v110_v39 = vmax.f32 %v100_v31, %v107_v36  ;;  %v149_v17 = vperm.slane %v75_v11, 2  ;;  %v115_v14 = vmax.f32 %v113_v13, 0.0  ;;  %v232_v31 = vperm.slane %v230_v25, 2 }
 0x111   :  { %vm213_vm15 = vcmp.ne.s32.totalorder %v211_v32, 0 }
 0x112   :  { %v112_v42 = vsub.f32 %v98_v38, %v110_v39  ;;  %vm234_vm14 = vcmp.eq.s32.totalorder %v232_v31, 1  ;;  %vm215_vm1 = vmand %vm207_vm9, %vm213_vm15 }
 0x113   :  { %v229_v44 = vsel %vm215_vm1, 1, %v402_v0  ;;  %vm302_vm1 = vcmask 1041408  }
 0x114   :  { %v114_v46 = vadd.f32 1.0, %v112_v42 }
 0x116   :  { %v116_v52 = vmax.f32 %v114_v46, 0.0 }
 0x118   :  { %v133_v53 = vpop.permute.xlu1 %132  ;;  %v148_v62 = vmul.f32 %v146_v54, %v116_v52 }
 0x119   :  { %v139_v59 = vmax.f32 %v129_v50, %v133_v53  ;;  %v231_v50 = vperm.slane %v229_v44, 2 }
 0x11b   :  { %v141_v6 = vsub.f32 %v127_v60, %v139_v59  ;;  %vm233_vm6 = vcmp.eq.s32.totalorder %v231_v50, 1 }
 0x11d   :  { %v143_v10 = vadd.f32 1.0, %v141_v6 }
 0x11f   :  { %v145_v16 = vmax.f32 %v143_v10, 0.0 }
 0x121   :  { %v147_v22 = vmul.f32 %v145_v16, %v115_v14 }
 0x156   :  { %v221_v53 = vpop.permute.xlu0 %220 }
 0x157   :  { %vm225_vm7 = vcmp.eq.s32.totalorder %v221_v53, 1 }
 0x15b   :  { %v159_v61 = vpop.permute.xlu2 %158 }
 0x15c   :  { %v162_v63 = vadd.f32 %v159_v61, %v150_v55 }
 0x15e   :  { %v164_v4 = vsub.f32 %v162_v63, %v148_v62 }
 0x160   :  { %340 = vrcp.f32 %v164_v4  ;;  %v191_v21 = vand.u32 2147483648, %v164_v4  ;;  %v189_v24 = vand.u32 2147483647, %v164_v4  ;;  %vm185_vm11 = vweird.f32 %v164_v4 }
 0x162   :  { %v192_v30 = vor.u32 1.1754944e-38, %v191_v21  ;;  %vm190_vm13 = vcmp.eq.f32.partialorder %v189_v24, 8.507059e+37 }
 0x164   :  { %v277_v26 = vpop.permute.xlu2 %276 }
 0x166   :  { %v341_v12 = vpop.eup %340 }
 0x167   :  { %v181_v15 = vmul.f32 %v341_v12, %v164_v4  ;;  %vm186_vm10 = vweird.f32 %v341_v12 }
 0x168   :  { %vm187_vm12 = vmor %vm185_vm11, %vm186_vm10 }
 0x169   :  { %v182_v18 = vsub.f32 1.0, %v181_v15 }
 0x16b   :  { %v154_v19 = vpop.permute.xlu1 %153  ;;  %v183_v20 = vmul.f32 %v341_v12, %v182_v18 }
 0x16c   :  { %v161_v23 = vadd.f32 %v154_v19, %v149_v17 }
 0x16d   :  { %v184_v27 = vadd.f32 %v341_v12, %v183_v20 }
 0x16e   :  { %v163_v28 = vsub.f32 %v161_v23, %v147_v22 }
 0x16f   :  { %v188_v29 = vsel %vm187_vm12, %v341_v12, %v184_v27 }
 0x170   :  { %342 = vrcp.f32 %v163_v28  ;;  %v193_v33 = vsel %vm190_vm13, %v192_v30, %v188_v29  ;;  %v176_v43 = vand.u32 2147483648, %v163_v28  ;;  %v174_v46 = vand.u32 2147483647, %v163_v28 }
 0x171   :  { %v194_v35 = vmul.f32 %v193_v33, %v148_v62  ;;  %vm170_vm3 = vweird.f32 %v163_v28 }
 0x172   :  { %v177_v52 = vor.u32 1.1754944e-38, %v176_v43  ;;  %vm175_vm5 = vcmp.eq.f32.partialorder %v174_v46, 8.507059e+37 }
 0x173   :  { %v224_v34 = vpop.permute.xlu1 %223 }
 0x174   :  { %vm226_vm0 = vcmp.eq.s32.totalorder %v224_v34, 1 }
 0x175   :  { %v228_v36 = vsel %vm226_vm0, 0.0, %v194_v35  ;;  %vm299_vm0 = vcmask 1040384  }
 0x176   :  { %v343_v37 = vpop.eup %342  ;;  %v236_v38 = vsel %vm234_vm14, -1.0, %v228_v36 }
 0x177   :  { %v166_v39 = vmul.f32 %v343_v37, %v163_v28  ;;  %v243_v40 = vrot.slane %v236_v38, 4  ;;  %vm171_vm2 = vweird.f32 %v343_v37 }
 0x178   :  { %vm172_vm4 = vmor %vm170_vm3, %vm171_vm2 }
 0x179   :  { %v167_v41 = vsub.f32 1.0, %v166_v39  ;;  %v244_v42 = vmax.f32 %v236_v38, %v243_v40 }
 0x17b   :  { %v168_v45 = vmul.f32 %v343_v37, %v167_v41  ;;  %v245_v47 = vrot.slane %v244_v42, 2 }
 0x17c   :  { %v281_v9 = vpop.permute.xlu1 %280 }
 0x17d   :  { %v169_v49 = vadd.f32 %v343_v37, %v168_v45  ;;  %v246_v51 = vmax.f32 %v244_v42, %v245_v47 }
 0x17f   :  { %v173_v54 = vsel %vm172_vm4, %v343_v37, %v169_v49  ;;  %v247_v55 = vrot.slane %v246_v51, 1 }
 0x180   :  { %v178_v56 = vsel %vm175_vm5, %v177_v52, %v173_v54 }
 0x181   :  { %v179_v58 = vmul.f32 %v178_v56, %v147_v22  ;;  %v248_v0 = vmax.f32 %v246_v51, %v247_v55 }
 0x183   :  { %v227_v59 = vsel %vm225_vm7, 0.0, %v179_v58  ;;  %vm252_vm8 = vcmp.eq.f32.partialorder %v236_v38, %v248_v0 }
 0x184   :  { %v235_v60 = vsel %vm233_vm6, -1.0, %v227_v59  ;;  %v254_v61 = vsel %vm252_vm8, %v250_v57, 8 }
 0x185   :  { %v237_v62 = vrot.slane %v235_v60, 4  ;;  %v264_v63 = vrot.slane %v254_v61, 4 }
 0x187   :  { %v238_v1 = vmax.f32 %v235_v60, %v237_v62  ;;  %vm265_vm9 = vcmp.lt.s32.totalorder %v254_v61, %v264_v63 }
 0x188   :  { %v266_v2 = vsel %vm265_vm9, %v254_v61, %v264_v63 }
 0x189   :  { %v239_v3 = vrot.slane %v238_v1, 2  ;;  %v267_v4 = vrot.slane %v266_v2, 2 }
 0x18b   :  { %v240_v5 = vmax.f32 %v238_v1, %v239_v3  ;;  %vm268_vm10 = vcmp.lt.s32.totalorder %v266_v2, %v267_v4 }
 0x18c   :  { %v269_v6 = vsel %vm268_vm10, %v266_v2, %v267_v4 }
 0x18d   :  { %v270_v7 = vrot.slane %v269_v6, 1  ;;  %v241_v8 = vrot.slane %v240_v5, 1 }
 0x18f   :  { %vm271_vm11 = vcmp.lt.s32.totalorder %v269_v6, %v270_v7  ;;  %v242_v10 = vmax.f32 %v240_v5, %v241_v8 }
 0x190   :  { %v272_v11 = vsel %vm271_vm11, %v269_v6, %v270_v7 }
 0x191   :  { %vm274_vm12 = vcmp.eq.s32.totalorder %v250_v57, %v272_v11  ;;  %vm251_vm13 = vcmp.eq.f32.partialorder %v235_v60, %v242_v10  ;;  %v298_v21 = vcvt.s32.f32 %v272_v11 }
 0x192   :  { %v284_v12 = vsel %vm274_vm12, %v281_v9, 0.0  ;;  %v253_v13 = vsel %vm251_vm13, %v250_v57, 8 }
 0x193   :  { %v291_v15 = vrot.slane %v284_v12, 4  ;;  %v255_v16 = vrot.slane %v253_v13, 4  ;;  %v301_v27 = vsel %vm299_vm0, %v248_v0, %v298_v21 }
 0x195   :  { %v292_v17 = vadd.f32 %v291_v15, %v284_v12  ;;  %vm256_vm14 = vcmp.lt.s32.totalorder %v253_v13, %v255_v16 }
 0x196   :  { %v257_v18 = vsel %vm256_vm14, %v253_v13, %v255_v16 }
 0x197   :  { %v293_v14 = vrot.slane %v292_v17, 2  ;;  %v258_v19 = vrot.slane %v257_v18, 2 }
 0x199   :  { %v294_v20 = vadd.f32 %v293_v14, %v292_v17  ;;  %vm259_vm15 = vcmp.lt.s32.totalorder %v257_v18, %v258_v19 }
 0x19a   :  { %v260_v22 = vsel %vm259_vm15, %v257_v18, %v258_v19 }
 0x19b   :  { %v295_v23 = vrot.slane %v294_v20, 1  ;;  %v261_v24 = vrot.slane %v260_v22, 1 }
 0x19d   :  { %v296_v25 = vadd.f32 %v295_v23, %v294_v20  ;;  %vm262_vm2 = vcmp.lt.s32.totalorder %v260_v22, %v261_v24 }
 0x19e   :  { %v263_v28 = vsel %vm262_vm2, %v260_v22, %v261_v24 }
 0x19f   :  { %v304_v29 = vsel %vm302_vm1, %v301_v27, %v296_v25  ;;  %vm273_vm3 = vcmp.eq.s32.totalorder %v250_v57, %v263_v28  ;;  %v297_v35 = vcvt.s32.f32 %v263_v28 }
 0x1a0   :  { %306 = vst [vmem:[%s463_s2 + $0x4] sm:$0x7] %v304_v29  ;;  %v283_v30 = vsel %vm273_vm3, %v277_v26, 0.0 }
 0x1a1   :  { %v285_v31 = vrot.slane %v283_v30, 4  ;;  %v300_v38 = vsel %vm299_vm0, %v242_v10, %v297_v35 }
 0x1a3   :  { %v286_v32 = vadd.f32 %v285_v31, %v283_v30 }
 0x1a5   :  { %v287_v33 = vrot.slane %v286_v32, 2 }
 0x1a7   :  { %v288_v34 = vadd.f32 %v287_v33, %v286_v32 }
 0x1a9   :  { %v289_v36 = vrot.slane %v288_v34, 1 }
 0x1ab   :  { %v290_v37 = vadd.f32 %v289_v36, %v288_v34 }
 0x1ad   :  { %v303_v39 = vsel %vm302_vm1, %v300_v38, %v290_v37 }
 0x1ae   :  { %305 = vst [vmem:[%s463_s2] sm:$0x7] %v303_v39 }
 0x1af   :  { %311 = vsyncpa [#allocation3], 1 }
 0x1b0   :  { %312 = vsyncpa [#allocation5], 1 }

</bundles_post_ra>
